<compile_context>
chip_gen: v5e
topology: v5e:2x2
jax: 0.10.0
libtpu: 0.0.40
codegen_flags: <defaults>
</compile_context>

<pallas_src>
import functools

import jax
import jax.numpy as jnp
from jax.experimental import pallas as pl
from jax.experimental.pallas import tpu as pltpu


_HAS_BUFFERED = hasattr(pl, "Buffered")


def _round_up(x, m):
    return ((x + m - 1) // m) * m


def residual_mlp_kernel(x_ref, w1_ref, b1_ref, w2_ref, b2_ref, o_ref, *,
                        gelu_bf16):
    # x_ref:  (tile_rows, Dp) f32
    # w1_ref: (Dp, Hp) bf16    b1_ref: (1, Hp) f32
    # w2_ref: (Hp, Dp) bf16    b2_ref: (1, Dp) f32
    x = x_ref[...]

    # Linear 1: bf16 MXU operands, f32 accumulation.
    h = jnp.dot(x.astype(jnp.bfloat16), w1_ref[...],
                preferred_element_type=jnp.float32)
    h = h + b1_ref[...]

    if gelu_bf16:
        # v6e/v7x: bf16 VPU/EUP -> run the GELU epilogue in bf16 and feed the
        # result straight into the second matmul (no extra cast).
        h = jax.nn.gelu(h.astype(jnp.bfloat16), approximate=True)
        y = jnp.dot(h, w2_ref[...], preferred_element_type=jnp.float32)
    else:
        # v5e (no bf16 VPU/EUP): keep the epilogue in f32.
        h = jax.nn.gelu(h, approximate=True)
        y = jnp.dot(h.astype(jnp.bfloat16), w2_ref[...],
                    preferred_element_type=jnp.float32)

    y = y + b2_ref[...]

    # ResidualAdd semantics: out = fn(x) + x   (residual kept in f32).
    o_ref[...] = (y + x.astype(jnp.float32)).astype(o_ref.dtype)


@functools.lru_cache(maxsize=1)
def _chip_config():
    """Per-generation tile / VMEM / epilogue choices."""
    try:
        kind = jax.devices()[0].device_kind.lower()
    except Exception:  # pragma: no cover - no accelerator visible
        kind = ""
    if ("v5 lite" in kind) or ("v5e" in kind) or ("v5lite" in kind):
        # 197 TF/s MXU: 256-row tiles already hide all grid/VPU overhead.
        return dict(tile_rows=256, vmem_limit=96 * 1024 * 1024, gelu_bf16=False)
    if "v7" in kind:
        # 64 MiB VMEM per TC: keep 256-row tiles, cap the scoped limit.
        return dict(tile_rows=256, vmem_limit=52 * 1024 * 1024, gelu_bf16=True)
    if "v6" in kind:
        # 128 MiB VMEM, 918 TF/s MXU: bigger tiles amortize per-step overhead.
        return dict(tile_rows=512, vmem_limit=96 * 1024 * 1024, gelu_bf16=True)
    # Unknown generation (v4/v5p/...): conservative defaults.
    return dict(tile_rows=256, vmem_limit=64 * 1024 * 1024, gelu_bf16=False)


def prepare_mlp_params(w1, b1, w2, b2, *, lane=128):
    """One-time weight prep (pad to lane multiples + bf16 cast).

    Hoisted out of the per-call path: do this at model-load time so every
    forward call doesn't pay an HBM pad/cast pre-pass.
    """
    D, H = w1.shape
    Dp = _round_up(D, lane)
    Hp = _round_up(H, lane)
    w1p = jnp.pad(w1, ((0, Dp - D), (0, Hp - H))).astype(jnp.bfloat16)
    w2p = jnp.pad(w2, ((0, Hp - H), (0, Dp - D))).astype(jnp.bfloat16)
    b1p = jnp.pad(b1, (0, Hp - H)).reshape(1, Hp).astype(jnp.float32)
    b2p = jnp.pad(b2, (0, Dp - D)).reshape(1, Dp).astype(jnp.float32)
    return w1p, b1p, w2p, b2p


@functools.partial(
    jax.jit,
    static_argnames=("tile_rows", "gelu_bf16", "vmem_limit_bytes",
                     "single_buffer_weights"))
def _residual_add_mlp_impl(x, w1p, b1p, w2p, b2p, *, tile_rows, gelu_bf16,
                           vmem_limit_bytes, single_buffer_weights):
    B, S, D = x.shape
    Dp, Hp = w1p.shape
    rows = B * S

    # Row tile: multiple of 8 (f32 sublane); clamp for tiny inputs.  Pad rows
    # up to a multiple of tile_rows so there is no masked tail tile and the
    # grid divides evenly (megacore sharding on v7x).
    tile_rows = min(tile_rows, _round_up(rows, 8))
    rows_p = _round_up(rows, tile_rows)

    x2 = x.reshape(rows, D)
    padded = (Dp != D) or (rows_p != rows)
    if padded:
        # Zero padding is exact: padded columns/rows of fn(x) + x are zero /
        # ignored and sliced away below.
        x2 = jnp.pad(x2, ((0, rows_p - rows), (0, Dp - D)))

    def _resident_spec(shape):
        # Constant index map -> the block is DMA'd once and revisited.  The
        # second pipeline buffer would be pure VMEM waste: single-buffer it.
        if single_buffer_weights and _HAS_BUFFERED:
            return pl.BlockSpec(shape, lambda i: (0, 0),
                                pipeline_mode=pl.Buffered(1))
        return pl.BlockSpec(shape, lambda i: (0, 0))

    grid = (rows_p // tile_rows,)
    kernel = functools.partial(residual_mlp_kernel, gelu_bf16=gelu_bf16)

    out = pl.pallas_call(
        kernel,
        out_shape=jax.ShapeDtypeStruct((rows_p, Dp), x.dtype),
        grid_spec=pltpu.PrefetchScalarGridSpec(
            num_scalar_prefetch=0,
            grid=grid,
            in_specs=[
                pl.BlockSpec((tile_rows, Dp), lambda i: (i, 0)),  # x row tile
                _resident_spec((Dp, Hp)),                          # w1
                _resident_spec((1, Hp)),                           # b1
                _resident_spec((Hp, Dp)),                          # w2
                _resident_spec((1, Dp)),                           # b2
            ],
            out_specs=pl.BlockSpec((tile_rows, Dp), lambda i: (i, 0)),
        ),
        compiler_params=pltpu.CompilerParams(
            dimension_semantics=("parallel",),   # row tiles shard across TCs
            vmem_limit_bytes=vmem_limit_bytes,
        ),
        # Alias the freshly-padded input buffer to the output: the x tile is
        # fully read into VMEM before the matching out tile is written back,
        # so per-block aliasing is safe and drops one HBM allocation.
        input_output_aliases=({0: 0} if padded else {}),
    )(x2, w1p, b1p, w2p, b2p)

    if padded:
        out = out[:rows, :D]
    return out.reshape(B, S, D)


def residual_add_mlp(x, prepared_params, *, tile_rows=None):
    """out = MLP(x) + x, fused in one Pallas kernel.

    x: (B, S, D) float32; prepared_params from prepare_mlp_params().
    """
    cfg = _chip_config()
    kwargs = dict(
        tile_rows=int(tile_rows if tile_rows is not None else cfg["tile_rows"]),
        gelu_bf16=bool(cfg["gelu_bf16"]),
        vmem_limit_bytes=int(cfg["vmem_limit"]),
    )
    w1p, b1p, w2p, b2p = prepared_params
    try:
        return _residual_add_mlp_impl(x, w1p, b1p, w2p, b2p,
                                      single_buffer_weights=True, **kwargs)
    except Exception:
        # Fallback for JAX versions that reject Buffered(1) on constant-index
        # (resident) blocks; correctness is unaffected.
        return _residual_add_mlp_impl(x, w1p, b1p, w2p, b2p,
                                      single_buffer_weights=False, **kwargs)


def reference(x, w1, b1, w2, b2):
    h = jax.nn.gelu(x @ w1 + b1, approximate=True)
    y = h @ w2 + b2
    return y + x


if __name__ == "__main__":
    # Small ViT-ish shapes: batch=2, seq=8, hidden=32, mlp expansion=4.
    B, S, D = 2, 8, 32
    H = 4 * D

    key = jax.random.PRNGKey(0)
    kx, k1, k2, k3, k4 = jax.random.split(key, 5)

    x = jax.random.normal(kx, (B, S, D), dtype=jnp.float32)
    w1 = jax.random.normal(k1, (D, H), dtype=jnp.float32) * 0.02
    b1 = jax.random.normal(k2, (H,), dtype=jnp.float32) * 0.02
    w2 = jax.random.normal(k3, (H, D), dtype=jnp.float32) * 0.02
    b2 = jax.random.normal(k4, (D,), dtype=jnp.float32) * 0.02

    # One-time weight prep (pad + bf16 cast), hoisted off the hot path.
    params = prepare_mlp_params(w1, b1, w2, b2)
    params = jax.tree_util.tree_map(jax.block_until_ready, params)

    out = residual_add_mlp(x, params)
    jax.block_until_ready(out)

    ref = reference(x, w1, b1, w2, b2)
    assert out.shape == x.shape and out.dtype == x.dtype
    # bf16 MXU operands / bf16 GELU (v6e/v7x) vs f32 reference -> loose tol.
    assert jnp.allclose(out, ref, atol=2e-2, rtol=2e-2), "mismatch vs reference"

    print("KERNEL_OK")
</pallas_src>

<mosaic_0001>
module attributes {stable_mosaic.version = 11 : i64} {
  func.func @residual_mlp_kernel(%arg0: i32, %arg1: memref<16x128xf32, #tpu.memory_space<vmem>>, %arg2: memref<128x128xbf16, #tpu.memory_space<vmem>>, %arg3: memref<1x128xf32, #tpu.memory_space<vmem>>, %arg4: memref<128x128xbf16, #tpu.memory_space<vmem>>, %arg5: memref<1x128xf32, #tpu.memory_space<vmem>>, %arg6: memref<16x128xf32, #tpu.memory_space<vmem>>) attributes {dimension_semantics = [#tpu.dimension_semantics<parallel>], iteration_bounds = array<i64: 1>, scalar_prefetch = 0 : i64, scratch_operands = 0 : i64, tpu.core_type = #tpu.core_type<tc>, window_params = [{transform_indices = @transform_0, window_bounds = array<i64: 16, 128>}, {pipeline_mode = #tpu.pipeline_mode<synchronous>, transform_indices = @transform_1, window_bounds = array<i64: 128, 128>}, {pipeline_mode = #tpu.pipeline_mode<synchronous>, transform_indices = @transform_2, window_bounds = array<i64: 1, 128>}, {pipeline_mode = #tpu.pipeline_mode<synchronous>, transform_indices = @transform_3, window_bounds = array<i64: 128, 128>}, {pipeline_mode = #tpu.pipeline_mode<synchronous>, transform_indices = @transform_4, window_bounds = array<i64: 1, 128>}, {transform_indices = @transform_5, window_bounds = array<i64: 16, 128>}]} {
    %c0 = arith.constant 0 : index
    %c0_0 = arith.constant 0 : index
    %0 = vector.load %arg1[%c0, %c0_0] : memref<16x128xf32, #tpu.memory_space<vmem>>, vector<16x128xf32>
    %1 = arith.truncf %0 : vector<16x128xf32> to vector<16x128xbf16>
    %c0_1 = arith.constant 0 : index
    %c0_2 = arith.constant 0 : index
    %2 = vector.load %arg2[%c0_1, %c0_2] : memref<128x128xbf16, #tpu.memory_space<vmem>>, vector<128x128xbf16>
    %cst = arith.constant dense<0.000000e+00> : vector<16x128xf32>
    %3 = tpu.matmul %1, %2, %cst {dimension_numbers = #tpu.dot_dimension_numbers<[1], [0], [0], [1], [0, 0, 1, 1], [], []>} : vector<16x128xbf16>, vector<128x128xbf16>, vector<16x128xf32> -> vector<16x128xf32>
    %c0_3 = arith.constant 0 : index
    %c0_4 = arith.constant 0 : index
    %4 = vector.load %arg3[%c0_3, %c0_4] : memref<1x128xf32, #tpu.memory_space<vmem>>, vector<1x128xf32>
    %5 = vector.broadcast %4 : vector<1x128xf32> to vector<16x128xf32>
    %6 = arith.addf %3, %5 : vector<16x128xf32>
    %7 = arith.mulf %6, %6 : vector<16x128xf32>
    %8 = arith.mulf %6, %7 : vector<16x128xf32>
    %cst_5 = arith.constant 4.471500e-02 : f32
    %9 = vector.broadcast %cst_5 : f32 to vector<16x128xf32>
    %10 = arith.mulf %9, %8 : vector<16x128xf32>
    %11 = arith.addf %6, %10 : vector<16x128xf32>
    %cst_6 = arith.constant 0.797884583 : f32
    %12 = vector.broadcast %cst_6 : f32 to vector<16x128xf32>
    %13 = arith.mulf %12, %11 : vector<16x128xf32>
    %14 = math.tanh %13 : vector<16x128xf32>
    %cst_7 = arith.constant 1.000000e+00 : f32
    %15 = vector.broadcast %cst_7 : f32 to vector<16x128xf32>
    %16 = arith.addf %15, %14 : vector<16x128xf32>
    %cst_8 = arith.constant 5.000000e-01 : f32
    %17 = vector.broadcast %cst_8 : f32 to vector<16x128xf32>
    %18 = arith.mulf %17, %16 : vector<16x128xf32>
    %19 = arith.mulf %6, %18 : vector<16x128xf32>
    %20 = arith.truncf %19 : vector<16x128xf32> to vector<16x128xbf16>
    %c0_9 = arith.constant 0 : index
    %c0_10 = arith.constant 0 : index
    %21 = vector.load %arg4[%c0_9, %c0_10] : memref<128x128xbf16, #tpu.memory_space<vmem>>, vector<128x128xbf16>
    %cst_11 = arith.constant dense<0.000000e+00> : vector<16x128xf32>
    %22 = tpu.matmul %20, %21, %cst_11 {dimension_numbers = #tpu.dot_dimension_numbers<[1], [0], [0], [1], [0, 0, 1, 1], [], []>} : vector<16x128xbf16>, vector<128x128xbf16>, vector<16x128xf32> -> vector<16x128xf32>
    %c0_12 = arith.constant 0 : index
    %c0_13 = arith.constant 0 : index
    %23 = vector.load %arg5[%c0_12, %c0_13] : memref<1x128xf32, #tpu.memory_space<vmem>>, vector<1x128xf32>
    %24 = vector.broadcast %23 : vector<1x128xf32> to vector<16x128xf32>
    %25 = arith.addf %22, %24 : vector<16x128xf32>
    %26 = arith.addf %25, %0 : vector<16x128xf32>
    %c0_14 = arith.constant 0 : index
    %c0_15 = arith.constant 0 : index
    %27 = vector.load %arg6[%c0_14, %c0_15] : memref<16x128xf32, #tpu.memory_space<vmem>>, vector<16x128xf32>
    tpu.vector_store %arg6[%c0_14, %c0_15], %26 {strides = array<i32>} : memref<16x128xf32, #tpu.memory_space<vmem>>, vector<16x128xf32>,
    return
  }
  func.func @transform_0(%arg0: i32) -> (i32, i32) {
    %c0_i32 = arith.constant 0 : i32
    %c0_i32_0 = arith.constant 0 : i32
    return %arg0, %c0_i32 : i32, i32
  }
  func.func @transform_1(%arg0: i32) -> (i32, i32) {
    %c0_i32 = arith.constant 0 : i32
    %c0_i32_0 = arith.constant 0 : i32
    %c0_i32_1 = arith.constant 0 : i32
    return %c0_i32, %c0_i32_0 : i32, i32
  }
  func.func @transform_2(%arg0: i32) -> (i32, i32) {
    %c0_i32 = arith.constant 0 : i32
    %c0_i32_0 = arith.constant 0 : i32
    %c0_i32_1 = arith.constant 0 : i32
    return %c0_i32, %c0_i32_0 : i32, i32
  }
  func.func @transform_3(%arg0: i32) -> (i32, i32) {
    %c0_i32 = arith.constant 0 : i32
    %c0_i32_0 = arith.constant 0 : i32
    %c0_i32_1 = arith.constant 0 : i32
    return %c0_i32, %c0_i32_0 : i32, i32
  }
  func.func @transform_4(%arg0: i32) -> (i32, i32) {
    %c0_i32 = arith.constant 0 : i32
    %c0_i32_0 = arith.constant 0 : i32
    %c0_i32_1 = arith.constant 0 : i32
    return %c0_i32, %c0_i32_0 : i32, i32
  }
  func.func @transform_5(%arg0: i32) -> (i32, i32) {
    %c0_i32 = arith.constant 0 : i32
    %c0_i32_0 = arith.constant 0 : i32
    return %arg0, %c0_i32 : i32, i32
  }
}

module attributes {stable_mosaic.version = 11 : i64} {
  func.func @residual_mlp_kernel(%arg0: i32, %arg1: memref<16x128xf32, #tpu.memory_space<vmem>>, %arg2: memref<128x128xbf16, #tpu.memory_space<vmem>>, %arg3: memref<1x128xf32, #tpu.memory_space<vmem>>, %arg4: memref<128x128xbf16, #tpu.memory_space<vmem>>, %arg5: memref<1x128xf32, #tpu.memory_space<vmem>>, %arg6: memref<16x128xf32, #tpu.memory_space<vmem>>) attributes {dimension_semantics = [#tpu.dimension_semantics<parallel>], iteration_bounds = array<i64: 1>, scalar_prefetch = 0 : i64, scratch_operands = 0 : i64, tpu.core_type = #tpu.core_type<tc>, window_params = [{transform_indices = @transform_0, window_bounds = array<i64: 16, 128>}, {pipeline_mode = #tpu.pipeline_mode<synchronous>, transform_indices = @transform_1, window_bounds = array<i64: 128, 128>}, {pipeline_mode = #tpu.pipeline_mode<synchronous>, transform_indices = @transform_2, window_bounds = array<i64: 1, 128>}, {pipeline_mode = #tpu.pipeline_mode<synchronous>, transform_indices = @transform_3, window_bounds = array<i64: 128, 128>}, {pipeline_mode = #tpu.pipeline_mode<synchronous>, transform_indices = @transform_4, window_bounds = array<i64: 1, 128>}, {transform_indices = @transform_5, window_bounds = array<i64: 16, 128>}]} {
    %c0 = arith.constant 0 : index
    %c0_0 = arith.constant 0 : index
    %0 = vector.load %arg1[%c0, %c0_0] : memref<16x128xf32, #tpu.memory_space<vmem>>, vector<16x128xf32>
    %1 = arith.truncf %0 : vector<16x128xf32> to vector<16x128xbf16>
    %c0_1 = arith.constant 0 : index
    %c0_2 = arith.constant 0 : index
    %2 = vector.load %arg2[%c0_1, %c0_2] : memref<128x128xbf16, #tpu.memory_space<vmem>>, vector<128x128xbf16>
    %cst = arith.constant dense<0.000000e+00> : vector<16x128xf32>
    %3 = tpu.matmul %1, %2, %cst {dimension_numbers = #tpu.dot_dimension_numbers<[1], [0], [0], [1], [0, 0, 1, 1], [], []>} : vector<16x128xbf16>, vector<128x128xbf16>, vector<16x128xf32> -> vector<16x128xf32>
    %c0_3 = arith.constant 0 : index
    %c0_4 = arith.constant 0 : index
    %4 = vector.load %arg3[%c0_3, %c0_4] : memref<1x128xf32, #tpu.memory_space<vmem>>, vector<1x128xf32>
    %5 = vector.broadcast %4 : vector<1x128xf32> to vector<16x128xf32>
    %6 = arith.addf %3, %5 : vector<16x128xf32>
    %7 = arith.mulf %6, %6 : vector<16x128xf32>
    %8 = arith.mulf %6, %7 : vector<16x128xf32>
    %cst_5 = arith.constant 4.471500e-02 : f32
    %9 = vector.broadcast %cst_5 : f32 to vector<16x128xf32>
    %10 = arith.mulf %9, %8 : vector<16x128xf32>
    %11 = arith.addf %6, %10 : vector<16x128xf32>
    %cst_6 = arith.constant 0.797884583 : f32
    %12 = vector.broadcast %cst_6 : f32 to vector<16x128xf32>
    %13 = arith.mulf %12, %11 : vector<16x128xf32>
    %14 = math.tanh %13 : vector<16x128xf32>
    %cst_7 = arith.constant 1.000000e+00 : f32
    %15 = vector.broadcast %cst_7 : f32 to vector<16x128xf32>
    %16 = arith.addf %15, %14 : vector<16x128xf32>
    %cst_8 = arith.constant 5.000000e-01 : f32
    %17 = vector.broadcast %cst_8 : f32 to vector<16x128xf32>
    %18 = arith.mulf %17, %16 : vector<16x128xf32>
    %19 = arith.mulf %6, %18 : vector<16x128xf32>
    %20 = arith.truncf %19 : vector<16x128xf32> to vector<16x128xbf16>
    %c0_9 = arith.constant 0 : index
    %c0_10 = arith.constant 0 : index
    %21 = vector.load %arg4[%c0_9, %c0_10] : memref<128x128xbf16, #tpu.memory_space<vmem>>, vector<128x128xbf16>
    %cst_11 = arith.constant dense<0.000000e+00> : vector<16x128xf32>
    %22 = tpu.matmul %20, %21, %cst_11 {dimension_numbers = #tpu.dot_dimension_numbers<[1], [0], [0], [1], [0, 0, 1, 1], [], []>} : vector<16x128xbf16>, vector<128x128xbf16>, vector<16x128xf32> -> vector<16x128xf32>
    %c0_12 = arith.constant 0 : index
    %c0_13 = arith.constant 0 : index
    %23 = vector.load %arg5[%c0_12, %c0_13] : memref<1x128xf32, #tpu.memory_space<vmem>>, vector<1x128xf32>
    %24 = vector.broadcast %23 : vector<1x128xf32> to vector<16x128xf32>
    %25 = arith.addf %22, %24 : vector<16x128xf32>
    %26 = arith.addf %25, %0 : vector<16x128xf32>
    %c0_14 = arith.constant 0 : index
    %c0_15 = arith.constant 0 : index
    %27 = vector.load %arg6[%c0_14, %c0_15] : memref<16x128xf32, #tpu.memory_space<vmem>>, vector<16x128xf32>
    tpu.vector_store %arg6[%c0_14, %c0_15], %26 {strides = array<i32>} : memref<16x128xf32, #tpu.memory_space<vmem>>, vector<16x128xf32>,
    return
  }
  func.func @transform_0(%arg0: i32) -> (i32, i32) {
    %c0_i32 = arith.constant 0 : i32
    %c0_i32_0 = arith.constant 0 : i32
    return %arg0, %c0_i32 : i32, i32
  }
  func.func @transform_1(%arg0: i32) -> (i32, i32) {
    %c0_i32 = arith.constant 0 : i32
    %c0_i32_0 = arith.constant 0 : i32
    %c0_i32_1 = arith.constant 0 : i32
    return %c0_i32, %c0_i32_0 : i32, i32
  }
  func.func @transform_2(%arg0: i32) -> (i32, i32) {
    %c0_i32 = arith.constant 0 : i32
    %c0_i32_0 = arith.constant 0 : i32
    %c0_i32_1 = arith.constant 0 : i32
    return %c0_i32, %c0_i32_0 : i32, i32
  }
  func.func @transform_3(%arg0: i32) -> (i32, i32) {
    %c0_i32 = arith.constant 0 : i32
    %c0_i32_0 = arith.constant 0 : i32
    %c0_i32_1 = arith.constant 0 : i32
    return %c0_i32, %c0_i32_0 : i32, i32
  }
  func.func @transform_4(%arg0: i32) -> (i32, i32) {
    %c0_i32 = arith.constant 0 : i32
    %c0_i32_0 = arith.constant 0 : i32
    %c0_i32_1 = arith.constant 0 : i32
    return %c0_i32, %c0_i32_0 : i32, i32
  }
  func.func @transform_5(%arg0: i32) -> (i32, i32) {
    %c0_i32 = arith.constant 0 : i32
    %c0_i32_0 = arith.constant 0 : i32
    return %arg0, %c0_i32 : i32, i32
  }
}

</mosaic_0001>

<bundles_post_ra>
// kernel: _residual_add_mlp_impl.1
= control target key start
LH: loop header
LB: loop body
LE: loop exit
PB: predicated region body
PF: predicated region fallthrough
CT: control target
= control target key end

     0   :  { %10 = vsyncpa [#allocation3], 0  ;;  %s448_s0 = inlined_call_operand.vmem [shape: f32[16,128], index: 0, kind: input, shape index: {}, may-alias: {0,5}]   ;;  %s449_s1 = inlined_call_operand.hbm [shape: bf16[128,128], index: 1, kind: input, shape index: {}]   ;;  %s450_s2 = inlined_call_operand.vmem [shape: f32[1,128], index: 2, kind: input, shape index: {}]   ;;  %s451_s3 = inlined_call_operand.hbm [shape: bf16[128,128], index: 3, kind: input, shape index: {}]   ;;  %s452_s4 = inlined_call_operand.vmem [shape: f32[1,128], index: 4, kind: input, shape index: {}]   ;;  %s453_s5 = inlined_call_operand.vmem [shape: f32[16,128], index: 5, kind: output, shape index: {}, may-alias: {0,5}]  }
   0x1   :  { %s18_s20 = sshll.u32 %s449_s1, 4  ;;  %s19_s20 = int_to_ptr.hbm [resolvable:$true] %s18_s20 }
   0x2   :  { %11 = vsyncpa [#allocation5], 0  ;;  %s390_s21 = smov [#allocation2]   ;;  %s33_s25 = sshll.u32 %s451_s3, 4  ;;  %s34_s25 = int_to_ptr.hbm [resolvable:$true] %s33_s25 }
   0x3   :  { %s20_s22 = sshll.u32 %s390_s21, 4  ;;  %s391_s26 = smov 64   ;;  %s21_s22 = int_to_ptr.vmem [resolvable:$true] %s20_s22 }
   0x4   :  { %s392_s27 = smov 4   ;;  %s393_s28 = smov [#allocation4]  }
   0x5   :  { %26 = dma.hbm_to_vmem [thread:$0]  %s19_s20, 1024, %s21_s22, [#allocation3], %s391_s26, %s391_s26, %s392_s27  }
   0x6   :  { %s35_s29 = sshll.u32 %s393_s28, 4  ;;  %s36_s29 = int_to_ptr.vmem [resolvable:$true] %s35_s29 }
   0x7   :  { %41 = dma.hbm_to_vmem [thread:$0]  %s34_s25, 1024, %s36_s29, [#allocation5], %s391_s26, %s391_s26, %s392_s27  }
   0x8   :  { %386 = dma.done.wait [#allocation3], 1024  }
   0x9   :  { %387 = vsyncadd [#allocation3], 4294966272 }
   0xa   :  { %388 = dma.done.wait [#allocation5], 1024  }
   0xb   :  { %389 = vsyncadd [#allocation5], 4294966272  ;;  %v319_v0 = vld [vmem:[#allocation2 + $0x38] sm:$0xff]  ;;  %v318_v1 = vld [vmem:[#allocation2 + $0x30] sm:$0xff] }
   0xc   :  { %123 = vmatpush.bf16.msra.mxu0 %v319_v0  ;;  %v317_v2 = vld [vmem:[#allocation2 + $0x28] sm:$0xff]  ;;  %v316_v3 = vld [vmem:[#allocation2 + $0x20] sm:$0xff]  ;;  %v315_v4 = vld [vmem:[#allocation2 + $0x18] sm:$0xff] }
   0xd   :  { %v314_v5 = vld [vmem:[#allocation2 + $0x10] sm:$0xff]  ;;  %v313_v6 = vld [vmem:[#allocation2 + $0x8] sm:$0xff]  ;;  %v312_v7 = vld [vmem:[#allocation2] sm:$0xff] }
   0xe   :  { %v52_v8 = vld [vmem:[%s448_s0] sm:$0xff]  ;;  %v53_v9 = vld [vmem:[%s448_s0 + $0x8] sm:$0xff]  ;;  %v327_v11 = vld [vmem:[#allocation4 + $0x38] sm:$0xff] }
   0xf   :  { %v54_v10 = vpack.c.bf16 %v53_v9, %v52_v8  ;;  %224 = vmatpush.bf16.msra.mxu1 %v327_v11  ;;  %v326_v12 = vld [vmem:[#allocation4 + $0x30] sm:$0xff]  ;;  %v325_v13 = vld [vmem:[#allocation4 + $0x28] sm:$0xff]  ;;  %v324_v14 = vld [vmem:[#allocation4 + $0x20] sm:$0xff] }
  0x10   :  { %124 = vmatpush.bf16.msra.mxu0 %v318_v1  ;;  %v323_v15 = vld [vmem:[#allocation4 + $0x18] sm:$0xff]  ;;  %v322_v16 = vld [vmem:[#allocation4 + $0x10] sm:$0xff]  ;;  %v321_v17 = vld [vmem:[#allocation4 + $0x8] sm:$0xff] }
  0x11   :  { %v332_v18 = vld [vmem:[%s450_s2] ss:$0 sm:$0xff] }
  0x12   :  { %v320_v19 = vld [vmem:[#allocation4] sm:$0xff] }
  0x13   :  { %225 = vmatpush.bf16.msra.mxu1 %v326_v12  ;;  %v333_v43 = vld [vmem:[%s452_s4] ss:$0 sm:$0xff] }
  0x14   :  { %125 = vmatpush.bf16.msra.mxu0 %v317_v2 }
  0x17   :  { %226 = vmatpush.bf16.msra.mxu1 %v325_v13 }
  0x18   :  { %126 = vmatpush.bf16.msra.mxu0 %v316_v3 }
  0x1b   :  { %227 = vmatpush.bf16.msra.mxu1 %v324_v14 }
  0x1c   :  { %127 = vmatpush.bf16.msra.mxu0 %v315_v4 }
  0x1f   :  { %228 = vmatpush.bf16.msra.mxu1 %v323_v15 }
  0x20   :  { %128 = vmatpush.bf16.msra.mxu0 %v314_v5 }
  0x23   :  { %229 = vmatpush.bf16.msra.mxu1 %v322_v16 }
  0x24   :  { %129 = vmatpush.bf16.msra.mxu0 %v313_v6 }
  0x27   :  { %230 = vmatpush.bf16.msra.mxu1 %v321_v17 }
  0x28   :  { %130 = vmatpush.bf16.msra.mxu0 %v312_v7 }
  0x2b   :  { %131 = vmatmul.bf16.vlgmr.msra.gmra.mxu0 %v54_v10  ;;  %231 = vmatpush.bf16.msra.mxu1 %v320_v19 }
  0xa8   :  { %v132_v20 = vpop.f32.mrf.mxu0 }
  0xa9   :  { %v133_v21 = vadd.f32 %v332_v18, %v132_v20 }
  0xab   :  { %v137_v22 = vmul.f32 %v133_v21, %v133_v21 }
  0xad   :  { %v139_v23 = vmul.f32 %v137_v22, %v133_v21 }
  0xaf   :  { %v141_v24 = vmul.f32 0.044715, %v139_v23 }
  0xb0   :  { %v134_v25 = vpop.f32.mrf.mxu0 }
  0xb1   :  { %v143_v26 = vadd.f32 %v141_v24, %v133_v21  ;;  %v135_v27 = vadd.f32 %v332_v18, %v134_v25 }
  0xb3   :  { %v138_v28 = vmul.f32 %v135_v27, %v135_v27  ;;  %v145_v29 = vmul.f32 0.7978846, %v143_v26 }
  0xb5   :  { %v140_v30 = vmul.f32 %v138_v28, %v135_v27  ;;  %334 = vtanh.f32 %v145_v29 }
  0xb7   :  { %v142_v31 = vmul.f32 0.044715, %v140_v30 }
  0xb9   :  { %v144_v32 = vadd.f32 %v142_v31, %v135_v27 }
  0xbb   :  { %v146_v33 = vmul.f32 0.7978846, %v144_v32  ;;  %v335_v34 = vpop.eup %334 }
  0xbc   :  { %v149_v35 = vadd.f32 1.0, %v335_v34 }
  0xbd   :  { %336 = vtanh.f32 %v146_v33 }
  0xbe   :  { %v151_v38 = vmul.f32 0.5, %v149_v35 }
  0xc0   :  { %v153_v40 = vmul.f32 %v151_v38, %v133_v21 }
  0xc3   :  { %v337_v36 = vpop.eup %336 }
  0xc4   :  { %v150_v37 = vadd.f32 1.0, %v337_v36 }
  0xc6   :  { %v152_v39 = vmul.f32 0.5, %v150_v37 }
  0xc8   :  { %v154_v41 = vmul.f32 %v152_v39, %v135_v27 }
  0xca   :  { %v155_v42 = vpack.c.bf16 %v154_v41, %v153_v40 }
  0xcc   :  { %232 = vmatmul.bf16.vlgmr.msra.gmra.mxu1 %v155_v42 }
 0x149   :  { %v233_v44 = vpop.f32.mrf.mxu1 }
 0x14a   :  { %v234_v45 = vadd.f32 %v333_v43, %v233_v44 }
 0x14c   :  { %v238_v46 = vadd.f32 %v234_v45, %v52_v8 }
 0x14e   :  { %240 = vst [vmem:[%s453_s5] sm:$0xff] %v238_v46 }
 0x151   :  { %v235_v47 = vpop.f32.mrf.mxu1 }
 0x152   :  { %v236_v48 = vadd.f32 %v333_v43, %v235_v47 }
 0x154   :  { %v239_v49 = vadd.f32 %v236_v48, %v53_v9 }
 0x156   :  { %241 = vst [vmem:[%s453_s5 + $0x8] sm:$0xff] %v239_v49 }
 0x157   :  { %246 = vsyncpa [#allocation3], 1 }
 0x158   :  { %247 = vsyncpa [#allocation5], 1 }

// kernel: _residual_add_mlp_impl.1
= control target key start
LH: loop header
LB: loop body
LE: loop exit
PB: predicated region body
PF: predicated region fallthrough
CT: control target
= control target key end

     0   :  { %10 = vsyncpa [#allocation3], 0  ;;  %s448_s0 = inlined_call_operand.vmem [shape: f32[16,128], index: 0, kind: input, shape index: {}, may-alias: {0,5}]   ;;  %s449_s1 = inlined_call_operand.hbm [shape: bf16[128,128], index: 1, kind: input, shape index: {}]   ;;  %s450_s2 = inlined_call_operand.vmem [shape: f32[1,128], index: 2, kind: input, shape index: {}]   ;;  %s451_s3 = inlined_call_operand.hbm [shape: bf16[128,128], index: 3, kind: input, shape index: {}]   ;;  %s452_s4 = inlined_call_operand.vmem [shape: f32[1,128], index: 4, kind: input, shape index: {}]   ;;  %s453_s5 = inlined_call_operand.vmem [shape: f32[16,128], index: 5, kind: output, shape index: {}, may-alias: {0,5}]  }
   0x1   :  { %s18_s20 = sshll.u32 %s449_s1, 4  ;;  %s19_s20 = int_to_ptr.hbm [resolvable:$true] %s18_s20 }
   0x2   :  { %11 = vsyncpa [#allocation5], 0  ;;  %s390_s21 = smov [#allocation2]   ;;  %s33_s25 = sshll.u32 %s451_s3, 4  ;;  %s34_s25 = int_to_ptr.hbm [resolvable:$true] %s33_s25 }
   0x3   :  { %s20_s22 = sshll.u32 %s390_s21, 4  ;;  %s391_s26 = smov 64   ;;  %s21_s22 = int_to_ptr.vmem [resolvable:$true] %s20_s22 }
   0x4   :  { %s392_s27 = smov 4   ;;  %s393_s28 = smov [#allocation4]  }
   0x5   :  { %26 = dma.hbm_to_vmem [thread:$0]  %s19_s20, 1024, %s21_s22, [#allocation3], %s391_s26, %s391_s26, %s392_s27  }
   0x6   :  { %s35_s29 = sshll.u32 %s393_s28, 4  ;;  %s36_s29 = int_to_ptr.vmem [resolvable:$true] %s35_s29 }
   0x7   :  { %41 = dma.hbm_to_vmem [thread:$0]  %s34_s25, 1024, %s36_s29, [#allocation5], %s391_s26, %s391_s26, %s392_s27  }
   0x8   :  { %386 = dma.done.wait [#allocation3], 1024  }
   0x9   :  { %387 = vsyncadd [#allocation3], 4294966272 }
   0xa   :  { %388 = dma.done.wait [#allocation5], 1024  }
   0xb   :  { %389 = vsyncadd [#allocation5], 4294966272  ;;  %v319_v0 = vld [vmem:[#allocation2 + $0x38] sm:$0xff]  ;;  %v318_v1 = vld [vmem:[#allocation2 + $0x30] sm:$0xff] }
   0xc   :  { %123 = vmatpush.bf16.msra.mxu0 %v319_v0  ;;  %v317_v2 = vld [vmem:[#allocation2 + $0x28] sm:$0xff]  ;;  %v316_v3 = vld [vmem:[#allocation2 + $0x20] sm:$0xff]  ;;  %v315_v4 = vld [vmem:[#allocation2 + $0x18] sm:$0xff] }
   0xd   :  { %v314_v5 = vld [vmem:[#allocation2 + $0x10] sm:$0xff]  ;;  %v313_v6 = vld [vmem:[#allocation2 + $0x8] sm:$0xff]  ;;  %v312_v7 = vld [vmem:[#allocation2] sm:$0xff] }
   0xe   :  { %v52_v8 = vld [vmem:[%s448_s0] sm:$0xff]  ;;  %v53_v9 = vld [vmem:[%s448_s0 + $0x8] sm:$0xff]  ;;  %v327_v11 = vld [vmem:[#allocation4 + $0x38] sm:$0xff] }
   0xf   :  { %v54_v10 = vpack.c.bf16 %v53_v9, %v52_v8  ;;  %224 = vmatpush.bf16.msra.mxu1 %v327_v11  ;;  %v326_v12 = vld [vmem:[#allocation4 + $0x30] sm:$0xff]  ;;  %v325_v13 = vld [vmem:[#allocation4 + $0x28] sm:$0xff]  ;;  %v324_v14 = vld [vmem:[#allocation4 + $0x20] sm:$0xff] }
  0x10   :  { %124 = vmatpush.bf16.msra.mxu0 %v318_v1  ;;  %v323_v15 = vld [vmem:[#allocation4 + $0x18] sm:$0xff]  ;;  %v322_v16 = vld [vmem:[#allocation4 + $0x10] sm:$0xff]  ;;  %v321_v17 = vld [vmem:[#allocation4 + $0x8] sm:$0xff] }
  0x11   :  { %v332_v18 = vld [vmem:[%s450_s2] ss:$0 sm:$0xff] }
  0x12   :  { %v320_v19 = vld [vmem:[#allocation4] sm:$0xff] }
  0x13   :  { %225 = vmatpush.bf16.msra.mxu1 %v326_v12  ;;  %v333_v43 = vld [vmem:[%s452_s4] ss:$0 sm:$0xff] }
  0x14   :  { %125 = vmatpush.bf16.msra.mxu0 %v317_v2 }
  0x17   :  { %226 = vmatpush.bf16.msra.mxu1 %v325_v13 }
  0x18   :  { %126 = vmatpush.bf16.msra.mxu0 %v316_v3 }
  0x1b   :  { %227 = vmatpush.bf16.msra.mxu1 %v324_v14 }
  0x1c   :  { %127 = vmatpush.bf16.msra.mxu0 %v315_v4 }
  0x1f   :  { %228 = vmatpush.bf16.msra.mxu1 %v323_v15 }
  0x20   :  { %128 = vmatpush.bf16.msra.mxu0 %v314_v5 }
  0x23   :  { %229 = vmatpush.bf16.msra.mxu1 %v322_v16 }
  0x24   :  { %129 = vmatpush.bf16.msra.mxu0 %v313_v6 }
  0x27   :  { %230 = vmatpush.bf16.msra.mxu1 %v321_v17 }
  0x28   :  { %130 = vmatpush.bf16.msra.mxu0 %v312_v7 }
  0x2b   :  { %131 = vmatmul.bf16.vlgmr.msra.gmra.mxu0 %v54_v10  ;;  %231 = vmatpush.bf16.msra.mxu1 %v320_v19 }
  0xa8   :  { %v132_v20 = vpop.f32.mrf.mxu0 }
  0xa9   :  { %v133_v21 = vadd.f32 %v332_v18, %v132_v20 }
  0xab   :  { %v137_v22 = vmul.f32 %v133_v21, %v133_v21 }
  0xad   :  { %v139_v23 = vmul.f32 %v137_v22, %v133_v21 }
  0xaf   :  { %v141_v24 = vmul.f32 0.044715, %v139_v23 }
  0xb0   :  { %v134_v25 = vpop.f32.mrf.mxu0 }
  0xb1   :  { %v143_v26 = vadd.f32 %v141_v24, %v133_v21  ;;  %v135_v27 = vadd.f32 %v332_v18, %v134_v25 }
  0xb3   :  { %v138_v28 = vmul.f32 %v135_v27, %v135_v27  ;;  %v145_v29 = vmul.f32 0.7978846, %v143_v26 }
  0xb5   :  { %v140_v30 = vmul.f32 %v138_v28, %v135_v27  ;;  %334 = vtanh.f32 %v145_v29 }
  0xb7   :  { %v142_v31 = vmul.f32 0.044715, %v140_v30 }
  0xb9   :  { %v144_v32 = vadd.f32 %v142_v31, %v135_v27 }
  0xbb   :  { %v146_v33 = vmul.f32 0.7978846, %v144_v32  ;;  %v335_v34 = vpop.eup %334 }
  0xbc   :  { %v149_v35 = vadd.f32 1.0, %v335_v34 }
  0xbd   :  { %336 = vtanh.f32 %v146_v33 }
  0xbe   :  { %v151_v38 = vmul.f32 0.5, %v149_v35 }
  0xc0   :  { %v153_v40 = vmul.f32 %v151_v38, %v133_v21 }
  0xc3   :  { %v337_v36 = vpop.eup %336 }
  0xc4   :  { %v150_v37 = vadd.f32 1.0, %v337_v36 }
  0xc6   :  { %v152_v39 = vmul.f32 0.5, %v150_v37 }
  0xc8   :  { %v154_v41 = vmul.f32 %v152_v39, %v135_v27 }
  0xca   :  { %v155_v42 = vpack.c.bf16 %v154_v41, %v153_v40 }
  0xcc   :  { %232 = vmatmul.bf16.vlgmr.msra.gmra.mxu1 %v155_v42 }
 0x149   :  { %v233_v44 = vpop.f32.mrf.mxu1 }
 0x14a   :  { %v234_v45 = vadd.f32 %v333_v43, %v233_v44 }
 0x14c   :  { %v238_v46 = vadd.f32 %v234_v45, %v52_v8 }
 0x14e   :  { %240 = vst [vmem:[%s453_s5] sm:$0xff] %v238_v46 }
 0x151   :  { %v235_v47 = vpop.f32.mrf.mxu1 }
 0x152   :  { %v236_v48 = vadd.f32 %v333_v43, %v235_v47 }
 0x154   :  { %v239_v49 = vadd.f32 %v236_v48, %v53_v9 }
 0x156   :  { %241 = vst [vmem:[%s453_s5 + $0x8] sm:$0xff] %v239_v49 }
 0x157   :  { %246 = vsyncpa [#allocation3], 1 }
 0x158   :  { %247 = vsyncpa [#allocation5], 1 }

</bundles_post_ra>
